<compile_context>
chip_gen: v6e
topology: v6e:2x2x1
jax: 0.10.0
libtpu: 0.0.40
codegen_flags: <defaults>
</compile_context>

<pallas_src>
import functools

import jax
import jax.numpy as jnp
from jax import lax
from jax.experimental import pallas as pl
from jax.experimental.pallas import tpu as pltpu


def _round_up(a, m):
    return (a + m - 1) // m * m


# ---------------------------------------------------------------------------
# Fused kernel.  Grid = (phase, image):
#   phase 0: conv (kH*kW shifted-view matmuls) + global BN-stats accumulation
#   phase 1: BN apply (per-channel scale/shift from the stats) + LeakyReLU
# Refs:
#   w_ref     : (kH*kW, C_out, C_in)  bf16   per-tap weights
#   x_ref     : (1, C_in, Sp)         bf16   width-padded flat input, one image
#   mask_ref  : (1, S_out)            f32    1.0 at valid output positions
#   gamma_ref : (C_out, 1)            f32
#   beta_ref  : (C_out, 1)            f32
#   o_ref     : (1, C_out, S_out)     f32    output (padded-flat layout)
#   y_buf     : (N, C_out, S_out)     f32    VMEM-resident conv output
#   s1/s2     : (C_out, 1)            f32    resident sum / sum-of-squares
# ---------------------------------------------------------------------------
def _fused_kernel(w_ref, x_ref, mask_ref, gamma_ref, beta_ref, o_ref,
                  y_buf, s1_ref, s2_ref, *, offsets, s_out, inv_count, eps):
    p = pl.program_id(0)   # phase
    n = pl.program_id(1)   # image

    @pl.when(p == 0)
    def _conv_and_stats():
        @pl.when(n == 0)
        def _init():
            s1_ref[...] = jnp.zeros_like(s1_ref)
            s2_ref[...] = jnp.zeros_like(s2_ref)

        x = x_ref[0]                                   # (C_in, Sp) bf16
        acc = None
        for t, off in enumerate(offsets):              # static unroll, kH*kW taps
            xs = x[:, off:off + s_out]                 # shifted lane view (tiny copy)
            d = jnp.dot(w_ref[t], xs, preferred_element_type=jnp.float32)
            acc = d if acc is None else acc + d

        y_buf[n] = acc                                 # stays in VMEM, no HBM
        m = mask_ref[...]                              # (1, S_out) validity mask
        s1_ref[...] += jnp.sum(acc * m, axis=1, keepdims=True)
        s2_ref[...] += jnp.sum(acc * acc * m, axis=1, keepdims=True)

    @pl.when(p == 1)
    def _bn_leaky():
        # TODO(synk): E[x^2]-E[x]^2 in f32 can cancel at very large N*HW /
        # large means; switch to centered partial sums if run at scale.
        mean = s1_ref[...] * inv_count
        var = jnp.maximum(s2_ref[...] * inv_count - mean * mean, 0.0)
        scale = gamma_ref[...] * lax.rsqrt(var + eps)
        shift = beta_ref[...] - mean * scale
        z = y_buf[n] * scale + shift
        o_ref[0] = jnp.where(z > 0, z, 0.1 * z)


# ------------------------------ wrapper (JAX) -------------------------------
def cnn_block(x, weight, gamma, beta, *, stride=1, padding=1, eps=1e-5):
    """x: (N, C_in, H, W) f32, weight: (C_out, C_in, kH, kW). Returns NCHW f32.

    Matches CNNBlock(bn_act=True): conv (no bias) -> BN(batch stats) -> LeakyReLU(0.1).
    """
    N, C_in, H, W = x.shape
    C_out, C_in_w, kH, kW = weight.shape
    assert C_in_w == C_in and kH == kW
    k = kH
    # TODO(synk): stride > 1 (dense compute + strided mask/crop) and the
    # bn_act=False branch (conv + bias, no BN/LeakyReLU) are not implemented.
    assert stride == 1, "only stride=1 implemented"

    Hp, Wp = H + 2 * padding, W + 2 * padding
    Ho, Wo = Hp - k + 1, Wp - k + 1                    # conv output spatial dims

    # Width-padded flat layout: output (h, w) lives at flat index h*Wp + w and
    # tap (i, j) of its receptive field at h*Wp + w + (i*Wp + j) in the padded
    # input, so the conv is kH*kW lane-shifted matmuls over one flat tile.
    s_out = _round_up(Ho * Wp, 128)                    # lane-dense output length
    max_off = (k - 1) * (Wp + 1)
    sp = _round_up(max(Hp * Wp, s_out + max_off), 128)

    xp = jnp.pad(x, ((0, 0), (0, 0), (padding, padding), (padding, padding)))
    x_flat = xp.reshape(N, C_in, Hp * Wp)
    x_flat = jnp.pad(x_flat, ((0, 0), (0, 0), (0, sp - Hp * Wp)))
    x_flat = x_flat.astype(jnp.bfloat16)               # bf16 stream, f32 accumulate

    # Per-tap weights, tap-major to match `offsets`.
    w_taps = jnp.transpose(weight, (2, 3, 0, 1)).reshape(k * k, C_out, C_in)
    w_taps = w_taps.astype(jnp.bfloat16)
    offsets = tuple(i * Wp + j for i in range(k) for j in range(k))

    # Validity mask over the flat (width-padded) output positions.
    s_idx = jnp.arange(s_out)
    valid = ((s_idx % Wp) < Wo) & ((s_idx // Wp) < Ho)
    mask = valid.astype(jnp.float32).reshape(1, s_out)

    inv_count = 1.0 / float(N * Ho * Wo)
    gamma2 = gamma.reshape(C_out, 1).astype(jnp.float32)
    beta2 = beta.reshape(C_out, 1).astype(jnp.float32)

    # The fused path keeps the whole conv output resident in VMEM.
    y_buf_bytes = N * C_out * s_out * 4
    assert y_buf_bytes <= 16 * 1024 * 1024, (
        "TODO(synk): fall back to a two-pass kernel (per-core stats partials) "
        "when y does not fit in VMEM")

    kernel = functools.partial(_fused_kernel, offsets=offsets, s_out=s_out,
                               inv_count=inv_count, eps=eps)

    cost = pl.CostEstimate(
        flops=2 * N * s_out * C_in * C_out * k * k + 8 * N * s_out * C_out,
        transcendentals=N * C_out,
        bytes_accessed=int(x_flat.size * 2 + w_taps.size * 2
                           + N * C_out * s_out * 4),
    )

    out_full = pl.pallas_call(
        kernel,
        out_shape=jax.ShapeDtypeStruct((N, C_out, s_out), jnp.float32),
        grid_spec=pltpu.PrefetchScalarGridSpec(
            num_scalar_prefetch=0,
            grid=(2, N),                               # (phase, image)
            in_specs=[
                pl.BlockSpec((k * k, C_out, C_in), lambda p, n: (0, 0, 0)),
                # phase 1 does not need x: pin its block index to 0 there so
                # no per-step input DMA is issued during the BN phase.
                pl.BlockSpec((1, C_in, sp), lambda p, n: ((1 - p) * n, 0, 0)),
                pl.BlockSpec((1, s_out), lambda p, n: (0, 0)),
                pl.BlockSpec((C_out, 1), lambda p, n: (0, 0)),
                pl.BlockSpec((C_out, 1), lambda p, n: (0, 0)),
            ],
            # Output block index stays 0 through phase 0 (never written there,
            # so no garbage write-back), then tracks the image in phase 1.
            out_specs=pl.BlockSpec((1, C_out, s_out), lambda p, n: (p * n, 0, 0)),
            scratch_shapes=[
                pltpu.VMEM((N, C_out, s_out), jnp.float32),   # resident y
                pltpu.VMEM((C_out, 1), jnp.float32),          # sum(y)
                pltpu.VMEM((C_out, 1), jnp.float32),          # sum(y*y)
            ],
        ),
        compiler_params=pltpu.CompilerParams(
            # Resident accumulators + cross-phase dependency => ordered grid.
            dimension_semantics=("arbitrary", "arbitrary"),
            vmem_limit_bytes=32 * 1024 * 1024,          # safe on v5e/v6e/v7x
        ),
        cost_estimate=cost,
    )(w_taps, x_flat, mask, gamma2, beta2)

    # Crop the width-padded flat layout back to NCHW (small XLA slice; far
    # cheaper than the old intermediate-y HBM round trip it replaces).
    out = out_full[:, :, :Ho * Wp].reshape(N, C_out, Ho, Wp)[:, :, :, :Wo]
    return out


# ---------------------------- pure-JAX reference ----------------------------
def cnn_block_ref(x, weight, gamma, beta, *, stride=1, padding=1):
    y = lax.conv_general_dilated(
        x, weight, window_strides=(stride, stride),
        padding=[(padding, padding), (padding, padding)],
        dimension_numbers=("NCHW", "OIHW", "NCHW"))
    mean = jnp.mean(y, axis=(0, 2, 3), keepdims=True)
    var = jnp.mean((y - mean) ** 2, axis=(0, 2, 3), keepdims=True)
    y_hat = (y - mean) * lax.rsqrt(var + 1e-5)
    z = y_hat * gamma.reshape(1, -1, 1, 1) + beta.reshape(1, -1, 1, 1)
    return jnp.where(z > 0, z, 0.1 * z)


# ---------------------------------- main -------------------------------------
if __name__ == "__main__":
    # CNNBlock(in_channels=4, out_channels=8, kernel_size=3, stride=1,
    #          padding=1, bn_act=True)  -> conv has no bias.
    N, C_in, H, W = 2, 4, 16, 16
    C_out, k = 8, 3

    key = jax.random.PRNGKey(0)
    kx, kw, kg, kb = jax.random.split(key, 4)
    x = jax.random.normal(kx, (N, C_in, H, W), dtype=jnp.float32)
    weight = jax.random.normal(kw, (C_out, C_in, k, k), dtype=jnp.float32) * 0.1
    gamma = 1.0 + 0.1 * jax.random.normal(kg, (C_out,), dtype=jnp.float32)
    beta = 0.1 * jax.random.normal(kb, (C_out,), dtype=jnp.float32)

    out = cnn_block(x, weight, gamma, beta, stride=1, padding=1)
    out = jax.block_until_ready(out)

    ref = cnn_block_ref(x, weight, gamma, beta, stride=1, padding=1)
    assert out.shape == (N, C_out, H, W), out.shape
    # bf16 matmul operands (f32 accumulation) -> loosened tolerance vs f32 ref.
    assert jnp.allclose(out, ref, atol=5e-2, rtol=5e-2), float(
        jnp.max(jnp.abs(out - ref)))

    print("KERNEL_OK")
</pallas_src>

<mosaic_0001>
module attributes {stable_mosaic.version = 11 : i64} {
  func.func @_fused_kernel(%arg0: i32, %arg1: i32, %arg2: memref<9x8x4xbf16, #tpu.memory_space<vmem>>, %arg3: memref<1x4x512xbf16, #tpu.memory_space<vmem>>, %arg4: memref<1x384xf32, #tpu.memory_space<vmem>>, %arg5: memref<8x1xf32, #tpu.memory_space<vmem>>, %arg6: memref<8x1xf32, #tpu.memory_space<vmem>>, %arg7: memref<1x8x384xf32, #tpu.memory_space<vmem>>, %arg8: memref<2x8x384xf32, #tpu.memory_space<vmem>>, %arg9: memref<8x1xf32, #tpu.memory_space<vmem>>, %arg10: memref<8x1xf32, #tpu.memory_space<vmem>>) attributes {dimension_semantics = [#tpu.dimension_semantics<arbitrary>, #tpu.dimension_semantics<arbitrary>], iteration_bounds = array<i64: 2, 2>, scalar_prefetch = 0 : i64, scratch_operands = 3 : i64, tpu.core_type = #tpu.core_type<tc>, window_params = [{pipeline_mode = #tpu.pipeline_mode<synchronous>, transform_indices = @transform_0, window_bounds = array<i64: 9, 8, 4>}, {transform_indices = @transform_1, window_bounds = array<i64: 1, 4, 512>}, {pipeline_mode = #tpu.pipeline_mode<synchronous>, transform_indices = @transform_2, window_bounds = array<i64: 1, 384>}, {pipeline_mode = #tpu.pipeline_mode<synchronous>, transform_indices = @transform_3, window_bounds = array<i64: 8, 1>}, {pipeline_mode = #tpu.pipeline_mode<synchronous>, transform_indices = @transform_4, window_bounds = array<i64: 8, 1>}, {transform_indices = @transform_5, window_bounds = array<i64: 1, 8, 384>}]} {
    %c0_i32 = arith.constant 0 : i32
    %0 = arith.cmpi eq, %arg0, %c0_i32 : i32
    %1 = arith.extui %0 : i1 to i32
    %c0_i32_0 = arith.constant 0 : i32
    %2 = arith.cmpi ne, %1, %c0_i32_0 : i32
    scf.if %2 {
      %c0_i32_2 = arith.constant 0 : i32
      %6 = arith.cmpi eq, %arg1, %c0_i32_2 : i32
      %7 = arith.extui %6 : i1 to i32
      %c0_i32_3 = arith.constant 0 : i32
      %8 = arith.cmpi ne, %7, %c0_i32_3 : i32
      scf.if %8 {
        %cst_47 = arith.constant 0.000000e+00 : f32
        %75 = vector.broadcast %cst_47 : f32 to vector<8x1xf32>
        %c0_48 = arith.constant 0 : index
        %c0_49 = arith.constant 0 : index
        %76 = vector.load %arg9[%c0_48, %c0_49] : memref<8x1xf32, #tpu.memory_space<vmem>>, vector<8x1xf32>
        tpu.vector_store %arg9[%c0_48, %c0_49], %75 {strides = array<i32>} : memref<8x1xf32, #tpu.memory_space<vmem>>, vector<8x1xf32>,
        %cst_50 = arith.constant 0.000000e+00 : f32
        %77 = vector.broadcast %cst_50 : f32 to vector<8x1xf32>
        %c0_51 = arith.constant 0 : index
        %c0_52 = arith.constant 0 : index
        %78 = vector.load %arg10[%c0_51, %c0_52] : memref<8x1xf32, #tpu.memory_space<vmem>>, vector<8x1xf32>
        tpu.vector_store %arg10[%c0_51, %c0_52], %77 {strides = array<i32>} : memref<8x1xf32, #tpu.memory_space<vmem>>, vector<8x1xf32>,
      } else {
      }
      %c0 = arith.constant 0 : index
      %c0_4 = arith.constant 0 : index
      %c0_5 = arith.constant 0 : index
      %9 = vector.load %arg3[%c0, %c0_4, %c0_5] : memref<1x4x512xbf16, #tpu.memory_space<vmem>>, vector<1x4x512xbf16>
      %10 = vector.shape_cast %9 : vector<1x4x512xbf16> to vector<4x512xbf16>
      %11 = vector.extract_strided_slice %10 {offsets = [0, 0], sizes = [4, 384], strides = [1, 1]} : vector<4x512xbf16> to vector<4x384xbf16>
      %c0_6 = arith.constant 0 : index
      %c0_7 = arith.constant 0 : index
      %c0_8 = arith.constant 0 : index
      %12 = vector.load %arg2[%c0_6, %c0_7, %c0_8] : memref<9x8x4xbf16, #tpu.memory_space<vmem>>, vector<1x8x4xbf16>
      %13 = vector.shape_cast %12 : vector<1x8x4xbf16> to vector<8x4xbf16>
      %cst = arith.constant dense<0.000000e+00> : vector<8x384xf32>
      %14 = tpu.matmul %13, %11, %cst {dimension_numbers = #tpu.dot_dimension_numbers<[1], [0], [0], [1], [0, 0, 1, 1], [], []>} : vector<8x4xbf16>, vector<4x384xbf16>, vector<8x384xf32> -> vector<8x384xf32>
      %15 = vector.extract_strided_slice %10 {offsets = [0, 1], sizes = [4, 384], strides = [1, 1]} : vector<4x512xbf16> to vector<4x384xbf16>
      %c1 = arith.constant 1 : index
      %c0_9 = arith.constant 0 : index
      %c0_10 = arith.constant 0 : index
      %16 = vector.load %arg2[%c1, %c0_9, %c0_10] : memref<9x8x4xbf16, #tpu.memory_space<vmem>>, vector<1x8x4xbf16>
      %17 = vector.shape_cast %16 : vector<1x8x4xbf16> to vector<8x4xbf16>
      %cst_11 = arith.constant dense<0.000000e+00> : vector<8x384xf32>
      %18 = tpu.matmul %17, %15, %cst_11 {dimension_numbers = #tpu.dot_dimension_numbers<[1], [0], [0], [1], [0, 0, 1, 1], [], []>} : vector<8x4xbf16>, vector<4x384xbf16>, vector<8x384xf32> -> vector<8x384xf32>
      %19 = arith.addf %14, %18 : vector<8x384xf32>
      %20 = vector.extract_strided_slice %10 {offsets = [0, 2], sizes = [4, 384], strides = [1, 1]} : vector<4x512xbf16> to vector<4x384xbf16>
      %c2 = arith.constant 2 : index
      %c0_12 = arith.constant 0 : index
      %c0_13 = arith.constant 0 : index
      %21 = vector.load %arg2[%c2, %c0_12, %c0_13] : memref<9x8x4xbf16, #tpu.memory_space<vmem>>, vector<1x8x4xbf16>
      %22 = vector.shape_cast %21 : vector<1x8x4xbf16> to vector<8x4xbf16>
      %cst_14 = arith.constant dense<0.000000e+00> : vector<8x384xf32>
      %23 = tpu.matmul %22, %20, %cst_14 {dimension_numbers = #tpu.dot_dimension_numbers<[1], [0], [0], [1], [0, 0, 1, 1], [], []>} : vector<8x4xbf16>, vector<4x384xbf16>, vector<8x384xf32> -> vector<8x384xf32>
      %24 = arith.addf %19, %23 : vector<8x384xf32>
      %25 = vector.extract_strided_slice %10 {offsets = [0, 18], sizes = [4, 384], strides = [1, 1]} : vector<4x512xbf16> to vector<4x384xbf16>
      %c3 = arith.constant 3 : index
      %c0_15 = arith.constant 0 : index
      %c0_16 = arith.constant 0 : index
      %26 = vector.load %arg2[%c3, %c0_15, %c0_16] : memref<9x8x4xbf16, #tpu.memory_space<vmem>>, vector<1x8x4xbf16>
      %27 = vector.shape_cast %26 : vector<1x8x4xbf16> to vector<8x4xbf16>
      %cst_17 = arith.constant dense<0.000000e+00> : vector<8x384xf32>
      %28 = tpu.matmul %27, %25, %cst_17 {dimension_numbers = #tpu.dot_dimension_numbers<[1], [0], [0], [1], [0, 0, 1, 1], [], []>} : vector<8x4xbf16>, vector<4x384xbf16>, vector<8x384xf32> -> vector<8x384xf32>
      %29 = arith.addf %24, %28 : vector<8x384xf32>
      %30 = vector.extract_strided_slice %10 {offsets = [0, 19], sizes = [4, 384], strides = [1, 1]} : vector<4x512xbf16> to vector<4x384xbf16>
      %c4 = arith.constant 4 : index
      %c0_18 = arith.constant 0 : index
      %c0_19 = arith.constant 0 : index
      %31 = vector.load %arg2[%c4, %c0_18, %c0_19] : memref<9x8x4xbf16, #tpu.memory_space<vmem>>, vector<1x8x4xbf16>
      %32 = vector.shape_cast %31 : vector<1x8x4xbf16> to vector<8x4xbf16>
      %cst_20 = arith.constant dense<0.000000e+00> : vector<8x384xf32>
      %33 = tpu.matmul %32, %30, %cst_20 {dimension_numbers = #tpu.dot_dimension_numbers<[1], [0], [0], [1], [0, 0, 1, 1], [], []>} : vector<8x4xbf16>, vector<4x384xbf16>, vector<8x384xf32> -> vector<8x384xf32>
      %34 = arith.addf %29, %33 : vector<8x384xf32>
      %35 = vector.extract_strided_slice %10 {offsets = [0, 20], sizes = [4, 384], strides = [1, 1]} : vector<4x512xbf16> to vector<4x384xbf16>
      %c5 = arith.constant 5 : index
      %c0_21 = arith.constant 0 : index
      %c0_22 = arith.constant 0 : index
      %36 = vector.load %arg2[%c5, %c0_21, %c0_22] : memref<9x8x4xbf16, #tpu.memory_space<vmem>>, vector<1x8x4xbf16>
      %37 = vector.shape_cast %36 : vector<1x8x4xbf16> to vector<8x4xbf16>
      %cst_23 = arith.constant dense<0.000000e+00> : vector<8x384xf32>
      %38 = tpu.matmul %37, %35, %cst_23 {dimension_numbers = #tpu.dot_dimension_numbers<[1], [0], [0], [1], [0, 0, 1, 1], [], []>} : vector<8x4xbf16>, vector<4x384xbf16>, vector<8x384xf32> -> vector<8x384xf32>
      %39 = arith.addf %34, %38 : vector<8x384xf32>
      %40 = vector.extract_strided_slice %10 {offsets = [0, 36], sizes = [4, 384], strides = [1, 1]} : vector<4x512xbf16> to vector<4x384xbf16>
      %c6 = arith.constant 6 : index
      %c0_24 = arith.constant 0 : index
      %c0_25 = arith.constant 0 : index
      %41 = vector.load %arg2[%c6, %c0_24, %c0_25] : memref<9x8x4xbf16, #tpu.memory_space<vmem>>, vector<1x8x4xbf16>
      %42 = vector.shape_cast %41 : vector<1x8x4xbf16> to vector<8x4xbf16>
      %cst_26 = arith.constant dense<0.000000e+00> : vector<8x384xf32>
      %43 = tpu.matmul %42, %40, %cst_26 {dimension_numbers = #tpu.dot_dimension_numbers<[1], [0], [0], [1], [0, 0, 1, 1], [], []>} : vector<8x4xbf16>, vector<4x384xbf16>, vector<8x384xf32> -> vector<8x384xf32>
      %44 = arith.addf %39, %43 : vector<8x384xf32>
      %45 = vector.extract_strided_slice %10 {offsets = [0, 37], sizes = [4, 384], strides = [1, 1]} : vector<4x512xbf16> to vector<4x384xbf16>
      %c7 = arith.constant 7 : index
      %c0_27 = arith.constant 0 : index
      %c0_28 = arith.constant 0 : index
      %46 = vector.load %arg2[%c7, %c0_27, %c0_28] : memref<9x8x4xbf16, #tpu.memory_space<vmem>>, vector<1x8x4xbf16>
      %47 = vector.shape_cast %46 : vector<1x8x4xbf16> to vector<8x4xbf16>
      %cst_29 = arith.constant dense<0.000000e+00> : vector<8x384xf32>
      %48 = tpu.matmul %47, %45, %cst_29 {dimension_numbers = #tpu.dot_dimension_numbers<[1], [0], [0], [1], [0, 0, 1, 1], [], []>} : vector<8x4xbf16>, vector<4x384xbf16>, vector<8x384xf32> -> vector<8x384xf32>
      %49 = arith.addf %44, %48 : vector<8x384xf32>
      %50 = vector.extract_strided_slice %10 {offsets = [0, 38], sizes = [4, 384], strides = [1, 1]} : vector<4x512xbf16> to vector<4x384xbf16>
      %c8 = arith.constant 8 : index
      %c0_30 = arith.constant 0 : index
      %c0_31 = arith.constant 0 : index
      %51 = vector.load %arg2[%c8, %c0_30, %c0_31] : memref<9x8x4xbf16, #tpu.memory_space<vmem>>, vector<1x8x4xbf16>
      %52 = vector.shape_cast %51 : vector<1x8x4xbf16> to vector<8x4xbf16>
      %cst_32 = arith.constant dense<0.000000e+00> : vector<8x384xf32>
      %53 = tpu.matmul %52, %50, %cst_32 {dimension_numbers = #tpu.dot_dimension_numbers<[1], [0], [0], [1], [0, 0, 1, 1], [], []>} : vector<8x4xbf16>, vector<4x384xbf16>, vector<8x384xf32> -> vector<8x384xf32>
      %54 = arith.addf %49, %53 : vector<8x384xf32>
      %55 = arith.index_cast %arg1 : i32 to index
      %c0_33 = arith.constant 0 : index
      %c0_34 = arith.constant 0 : index
      %56 = vector.load %arg8[%55, %c0_33, %c0_34] : memref<2x8x384xf32, #tpu.memory_space<vmem>>, vector<1x8x384xf32>
      %57 = vector.shape_cast %56 : vector<1x8x384xf32> to vector<8x384xf32>
      %58 = vector.shape_cast %54 : vector<8x384xf32> to vector<1x8x384xf32>
      tpu.vector_store %arg8[%55, %c0_33, %c0_34], %58 {strides = array<i32>} : memref<2x8x384xf32, #tpu.memory_space<vmem>>, vector<1x8x384xf32>,
      %c0_35 = arith.constant 0 : index
      %c0_36 = arith.constant 0 : index
      %59 = vector.load %arg4[%c0_35, %c0_36] : memref<1x384xf32, #tpu.memory_space<vmem>>, vector<1x384xf32>
      %c0_37 = arith.constant 0 : index
      %c0_38 = arith.constant 0 : index
      %60 = vector.load %arg9[%c0_37, %c0_38] : memref<8x1xf32, #tpu.memory_space<vmem>>, vector<8x1xf32>
      %61 = vector.broadcast %59 : vector<1x384xf32> to vector<8x384xf32>
      %62 = arith.mulf %54, %61 : vector<8x384xf32>
      %cst_39 = arith.constant dense<0.000000e+00> : vector<8xf32>
      %63 = vector.multi_reduction <add>, %62, %cst_39 [1] : vector<8x384xf32> to vector<8xf32>
      %64 = vector.shape_cast %63 : vector<8xf32> to vector<8x1xf32>
      %65 = arith.addf %60, %64 : vector<8x1xf32>
      %c0_40 = arith.constant 0 : index
      %c0_41 = arith.constant 0 : index
      %66 = vector.load %arg9[%c0_40, %c0_41] : memref<8x1xf32, #tpu.memory_space<vmem>>, vector<8x1xf32>
      tpu.vector_store %arg9[%c0_40, %c0_41], %65 {strides = array<i32>} : memref<8x1xf32, #tpu.memory_space<vmem>>, vector<8x1xf32>,
      %c0_42 = arith.constant 0 : index
      %c0_43 = arith.constant 0 : index
      %67 = vector.load %arg10[%c0_42, %c0_43] : memref<8x1xf32, #tpu.memory_space<vmem>>, vector<8x1xf32>
      %68 = arith.mulf %54, %54 : vector<8x384xf32>
      %69 = vector.broadcast %59 : vector<1x384xf32> to vector<8x384xf32>
      %70 = arith.mulf %68, %69 : vector<8x384xf32>
      %cst_44 = arith.constant dense<0.000000e+00> : vector<8xf32>
      %71 = vector.multi_reduction <add>, %70, %cst_44 [1] : vector<8x384xf32> to vector<8xf32>
      %72 = vector.shape_cast %71 : vector<8xf32> to vector<8x1xf32>
      %73 = arith.addf %67, %72 : vector<8x1xf32>
      %c0_45 = arith.constant 0 : index
      %c0_46 = arith.constant 0 : index
      %74 = vector.load %arg10[%c0_45, %c0_46] : memref<8x1xf32, #tpu.memory_space<vmem>>, vector<8x1xf32>
      tpu.vector_store %arg10[%c0_45, %c0_46], %73 {strides = array<i32>} : memref<8x1xf32, #tpu.memory_space<vmem>>, vector<8x1xf32>,
    } else {
    }
    %c1_i32 = arith.constant 1 : i32
    %3 = arith.cmpi eq, %arg0, %c1_i32 : i32
    %4 = arith.extui %3 : i1 to i32
    %c0_i32_1 = arith.constant 0 : i32
    %5 = arith.cmpi ne, %4, %c0_i32_1 : i32
    scf.if %5 {
      %c0 = arith.constant 0 : index
      %c0_2 = arith.constant 0 : index
      %6 = vector.load %arg9[%c0, %c0_2] : memref<8x1xf32, #tpu.memory_space<vmem>>, vector<8x1xf32>
      %cst = arith.constant 0.001953125 : f32
      %7 = vector.broadcast %cst : f32 to vector<8x1xf32>
      %8 = arith.mulf %6, %7 : vector<8x1xf32>
      %c0_3 = arith.constant 0 : index
      %c0_4 = arith.constant 0 : index
      %9 = vector.load %arg10[%c0_3, %c0_4] : memref<8x1xf32, #tpu.memory_space<vmem>>, vector<8x1xf32>
      %cst_5 = arith.constant 0.001953125 : f32
      %10 = vector.broadcast %cst_5 : f32 to vector<8x1xf32>
      %11 = arith.mulf %9, %10 : vector<8x1xf32>
      %12 = arith.mulf %8, %8 : vector<8x1xf32>
      %13 = arith.subf %11, %12 : vector<8x1xf32>
      %cst_6 = arith.constant 0.000000e+00 : f32
      %14 = vector.broadcast %cst_6 : f32 to vector<8x1xf32>
      %15 = arith.maximumf %13, %14 : vector<8x1xf32>
      %c0_7 = arith.constant 0 : index
      %c0_8 = arith.constant 0 : index
      %16 = vector.load %arg5[%c0_7, %c0_8] : memref<8x1xf32, #tpu.memory_space<vmem>>, vector<8x1xf32>
      %cst_9 = arith.constant 9.99999974E-6 : f32
      %17 = vector.broadcast %cst_9 : f32 to vector<8x1xf32>
      %18 = arith.addf %15, %17 : vector<8x1xf32>
      %19 = math.rsqrt %18 : vector<8x1xf32>
      %20 = arith.mulf %16, %19 : vector<8x1xf32>
      %c0_10 = arith.constant 0 : index
      %c0_11 = arith.constant 0 : index
      %21 = vector.load %arg6[%c0_10, %c0_11] : memref<8x1xf32, #tpu.memory_space<vmem>>, vector<8x1xf32>
      %22 = arith.mulf %8, %20 : vector<8x1xf32>
      %23 = arith.subf %21, %22 : vector<8x1xf32>
      %24 = arith.index_cast %arg1 : i32 to index
      %c0_12 = arith.constant 0 : index
      %c0_13 = arith.constant 0 : index
      %25 = vector.load %arg8[%24, %c0_12, %c0_13] : memref<2x8x384xf32, #tpu.memory_space<vmem>>, vector<1x8x384xf32>
      %26 = vector.shape_cast %25 : vector<1x8x384xf32> to vector<8x384xf32>
      %27 = vector.broadcast %20 : vector<8x1xf32> to vector<8x384xf32>
      %28 = arith.mulf %26, %27 : vector<8x384xf32>
      %29 = vector.broadcast %23 : vector<8x1xf32> to vector<8x384xf32>
      %30 = arith.addf %28, %29 : vector<8x384xf32>
      %cst_14 = arith.constant 0.000000e+00 : f32
      %31 = vector.broadcast %cst_14 : f32 to vector<8x384xf32>
      %32 = arith.cmpf ogt, %30, %31 : vector<8x384xf32>
      %cst_15 = arith.constant 1.000000e-01 : f32
      %33 = vector.broadcast %cst_15 : f32 to vector<8x384xf32>
      %34 = arith.mulf %33, %30 : vector<8x384xf32>
      %35 = arith.select %32, %30, %34 : vector<8x384xi1>, vector<8x384xf32>
      %c0_16 = arith.constant 0 : index
      %c0_17 = arith.constant 0 : index
      %c0_18 = arith.constant 0 : index
      %36 = vector.load %arg7[%c0_16, %c0_17, %c0_18] : memref<1x8x384xf32, #tpu.memory_space<vmem>>, vector<1x8x384xf32>
      %37 = vector.shape_cast %36 : vector<1x8x384xf32> to vector<8x384xf32>
      %38 = vector.shape_cast %35 : vector<8x384xf32> to vector<1x8x384xf32>
      tpu.vector_store %arg7[%c0_16, %c0_17, %c0_18], %38 {strides = array<i32>} : memref<1x8x384xf32, #tpu.memory_space<vmem>>, vector<1x8x384xf32>,
    } else {
    }
    return
  }
  func.func @transform_0(%arg0: i32, %arg1: i32) -> (i32, i32, i32) {
    %c0_i32 = arith.constant 0 : i32
    %c0_i32_0 = arith.constant 0 : i32
    %c0_i32_1 = arith.constant 0 : i32
    %c0_i32_2 = arith.constant 0 : i32
    return %c0_i32, %c0_i32_0, %c0_i32_1 : i32, i32, i32
  }
  func.func @transform_1(%arg0: i32, %arg1: i32) -> (i32, i32, i32) {
    %c1_i32 = arith.constant 1 : i32
    %0 = arith.subi %c1_i32, %arg0 : i32
    %1 = arith.muli %0, %arg1 : i32
    %c0_i32 = arith.constant 0 : i32
    %c0_i32_0 = arith.constant 0 : i32
    %c0_i32_1 = arith.constant 0 : i32
    return %1, %c0_i32, %c0_i32_0 : i32, i32, i32
  }
  func.func @transform_2(%arg0: i32, %arg1: i32) -> (i32, i32) {
    %c0_i32 = arith.constant 0 : i32
    %c0_i32_0 = arith.constant 0 : i32
    %c0_i32_1 = arith.constant 0 : i32
    return %c0_i32, %c0_i32_0 : i32, i32
  }
  func.func @transform_3(%arg0: i32, %arg1: i32) -> (i32, i32) {
    %c0_i32 = arith.constant 0 : i32
    %c0_i32_0 = arith.constant 0 : i32
    %c0_i32_1 = arith.constant 0 : i32
    return %c0_i32, %c0_i32_0 : i32, i32
  }
  func.func @transform_4(%arg0: i32, %arg1: i32) -> (i32, i32) {
    %c0_i32 = arith.constant 0 : i32
    %c0_i32_0 = arith.constant 0 : i32
    %c0_i32_1 = arith.constant 0 : i32
    return %c0_i32, %c0_i32_0 : i32, i32
  }
  func.func @transform_5(%arg0: i32, %arg1: i32) -> (i32, i32, i32) {
    %0 = arith.muli %arg0, %arg1 : i32
    %c0_i32 = arith.constant 0 : i32
    %c0_i32_0 = arith.constant 0 : i32
    %c0_i32_1 = arith.constant 0 : i32
    return %0, %c0_i32, %c0_i32_0 : i32, i32, i32
  }
}

</mosaic_0001>

<bundles_post_ra>
// kernel: tpu_custom_call.1
= control target key start
LH: loop header
LB: loop body
LE: loop exit
PB: predicated region body
PF: predicated region fallthrough
CT: control target
= control target key end

     0   :  { %s2073_s0 = inlined_call_operand.vmem [shape: bf16[9,8,4], index: 0, kind: input, shape index: {}]   ;;  %s2074_s1 = inlined_call_operand.vmem [shape: bf16[2,4,512], index: 1, kind: input, shape index: {}]   ;;  %s2075_s2 = inlined_call_operand.vmem [shape: f32[1,384], index: 2, kind: input, shape index: {}]   ;;  %s2076_s3 = inlined_call_operand.vmem [shape: f32[8,1], index: 3, kind: input, shape index: {}]   ;;  %s2077_s4 = inlined_call_operand.vmem [shape: f32[8,1], index: 4, kind: input, shape index: {}]   ;;  %s2078_s5 = inlined_call_operand.hbm [shape: f32[2,8,384], index: 5, kind: output, shape index: {}]  }
   0x1   :  { %2079 = sst [smem:[#allocation8_spill]] %s2073_s0 }
   0x2   :  { %10 = vsyncpa [#allocation6], 0 }
   0x3   :  { %12 = vsyncpa [#allocation6 + $0x1], 0  ;;  %s1800_s18 = smov 0   ;;  %s1802_s19 = smov 0  }
   0x4   :  { %s1804_s20 = smov 0   ;;  %s1806_s21 = smov 0  }
   0x5   :  { %s1808_s22 = smov 0   ;;  %s1810_s23 = smov 0  }
   0x6   :  { %s1812_s24 = smov 0   ;;  %s1814_s25 = smov 0  }
   0x7 LB: > { %s1445_s26 = sadd.s32 4294967295, %s1753_s25   ;;  %s1446_s27 = sadd.s32 4294967294, %s1753_s25   ;;  %s1753_s25 = sphi %s1814_s25, %s18_s25   ;;  %s1749_s24 = sphi %s1812_s24, %s2089_s24   ;;  %s1745_s23 = sphi %s1810_s23, %s2088_s23   ;;  %s1741_s22 = sphi %s1808_s22, %s2087_s22   ;;  %s1737_s21 = sphi %s1806_s21, %s2086_s21   ;;  %s1733_s20 = sphi %s1804_s20, %s2085_s20   ;;  %s1729_s19 = sphi %s1802_s19, %s2084_s19   ;;  %s1725_s18 = sphi %s1800_s18, %s2083_s18  }
   0x8   : > { %s27_s28 = sadd.s32 1, %s1745_s23  ;;  %s30_s29 = sadd.s32 1, %s1749_s24 }
   0x9   : > { %p28_p0 = scmp.ge.s32.totalorder %s27_s28, 2  ;;  %s148_s30 = smul.u32 %s1745_s23, %s1749_s24 }
   0xa   : > { %p163_p1 = scmp.ne.s32.totalorder %s1733_s20, %s1729_s19  ;;  %p164_p2 = scmp.eq.s32.totalorder %s1445_s26, 3 }
   0xb   : > { %s2091_s28 = smov (%p28_p0, %s27_s28), 0  ;;  %s2093_s29 = smov (!%p28_p0, %s30_s29), %s1749_s24 }
   0xc   : > { %p169_p3 = scmp.ne.s32.totalorder %s1729_s19, %s1725_s18  ;;  %p32_p4 = scmp.ge.s32.totalorder %s2093_s29, 2 }
   0xd   : > { %p170_p5 = scmp.eq.s32.totalorder %s1446_s27, 3  ;;  %p1853_p6 = por %p164_p2, %p163_p1 }
   0xe   : > { %p1449_p7 = scmp.ge.s32.totalorder %s1753_s25, 1  ;;  %s2095_s29 = smov (%p32_p4, %s2093_s29), 0 }
   0xf   : > { %p1860_p8 = por %p170_p5, %p169_p3  ;;  %p212_p9 = scmp.lt.s32.totalorder %s1753_s25, 5 }
  0x10   : > { %s149_s8 = smul.u32 %s2095_s29, %s2091_s28  ;;  %s153_s10 = sadd.s32 1, %s1733_s20 }
  0x11   : > { %p213_p10 = pnand %p1449_p7, %p212_p9 }
  0x12   : > { %s150_s9 = ssub.s32 %s148_s30, %s149_s8  ;;  %s239_s12 = sand.u32 (!%p213_p10), 1, %s1729_s19  }
  0x13   : > { %p151_p11 = scmp.eq.s32.totalorder %s150_s9, 0  ;;  %216 = sbr.rel (%p213_p10) target bundleno = 774 (0x306), region = 40 }
  0x14   : > { %s242_s13 = ssub.s32 (!%p213_p10), 1, %s1741_s22  ;;  %s1570_s14 = smul.u32 (!%p213_p10), 24, %s239_s12 }
  0x15   : > { %s1869_s11 = scalar_select %p151_p11, %s1733_s20, %s153_s10  }
  0x16   : > { %s243_s15 = smul.u32 (!%p213_p10), %s1737_s21, %s242_s13  ;;  %s1879_s30 = scalar_lea.vmem (!%p213_p10), [#allocation5], %s1570_s14 }
  0x17   : > { %p1452_p13 = scmp.ne.s32.totalorder (!%p213_p10), %s1741_s22, 0 }
  0x18   : > { %p244_p12 = scmp.lt.s32.totalorder %s243_s15, 1  ;;  %p1453_p0 = scmp.ne.s32.totalorder (!%p1452_p13), %s1737_s21, 0 }
  0x19   : > { %256 = sbr.rel (%p1452_p13) target bundleno = 580 (0x244), region = 44 }
  0x1a   : > { %s2097_s15 = smov (!%p244_p12, %s243_s15), 1 }
  0x1b   : > { %s1495_s16 = sshll.u32 %s2097_s15, 3 }
  0x1c   : > { %s248_s27 = scalar_lea.vmem %s2074_s1, %s1495_s16 }
  0x1e   : > { %260 = sbr.rel (%p1453_p0) target bundleno = 37 (0x25), region = 48 }
  0x23   : > { %vm261_vm0 = vcmask 7168   ;;  %v1755_v0 = vmov 0.0  }
  0x24   : > { %262 = vst.msk [vmem:[#allocation3] sm:$0xff] %vm261_vm0, %v1755_v0  ;;  %263 = vst.msk [vmem:[#allocation4] sm:$0xff] %vm261_vm0, %v1755_v0 }
  0x25 PF: > { %v264_v1 = vld [vmem:[%s248_s27] sm:$0xff]  ;;  %v273_v2 = vlaneseq  ;;  %v1756_v3 = vmov 1983009808   ;;  %v1757_v6 = vmov 0.0   ;;  %v1758_v9 = vmov 0   ;;  %s1760_s8 = smov 127  }
  0x26   : > { %v271_v4 = vunpack.c.l.s4 %v1756_v3  ;;  %1516 = vmatprep.subr.bf16.mxu1 %v1757_v6  ;;  %v269_v8 = vcombine.high %v264_v1, %v264_v1  ;;  %344 = vmatprep.mubr.bf16.mxu0 %v1758_v9  ;;  %vm1759_vm1 = vmmov 0   ;;  %s1761_s9 = smov 126   ;;  %s1762_s10 = smov 110   ;;  %vm294_vm2 = vcmask 1039360  }
  0x27   : > { %v1883_v5 = vshrl.u32 %v273_v2, 7  ;;  %1518 = vmatprep.mubr.msk.bf16.mxu1 %vm1759_vm1, %v1757_v6  ;;  %s1763_s13 = smov 109   ;;  %s1764_s14 = smov 108   ;;  %vm302_vm3 = vcmask 1041408   ;;  %vm298_vm4 = vcmask 31744   ;;  %vm496_vm5 = vcmask 1031168  }
  0x28   : > { %v272_v7 = vunpack.c.0.s8 %v271_v4  ;;  %s1765_s15 = smov 92   ;;  %s1766_s16 = smov 91   ;;  %vm606_vm6 = vcmask 900096   ;;  %vm716_vm7 = vcmask 891904   ;;  %vm826_vm8 = vcmask 883712  }
  0x29   : > { %s1767_s17 = smov 90   ;;  %s2082_s0 = sld [smem:[#allocation8_spill]]  ;;  %vm936_vm9 = vcmask 752640   ;;  %vm1046_vm10 = vcmask 744448   ;;  %vm1156_vm11 = vcmask 736256   ;;  %vm1288_vm12 = vcmask 7168  }
  0x2a   : > { %v275_v10 = vsub.s32 %v272_v7, %v1883_v5 }
  0x2c   : > { %v276_v11 = vrot.slane %v264_v1, %v275_v10  ;;  %v1890_v12 = vrot.slane %v269_v8, %v275_v10 }
  0x2e   : > { %286 = vrot.lane.b32.xlu0 %v276_v11, %s1760_s8  ;;  %290 = vrot.lane.b32.xlu1 %v1890_v12, %s1760_s8  ;;  %v284_v13 = vcombine.high %v276_v11, %v276_v11  ;;  %v285_v14 = vcombine.high %v1890_v12, %v1890_v12  ;;  %v397_v26 = vsel %vm302_vm3, %v276_v11, 0  ;;  %v403_v28 = vsel %vm302_vm3, %v1890_v12, 0 }
  0x2f   : > { %v1454_v24 = vld [vmem:[%s2082_s0 + $0x4] sm:$0xf]  ;;  %v265_v34 = vld [vmem:[%s2082_s0] sm:$0xf]  ;;  %v1461_v44 = vld [vmem:[%s2082_s0 + $0x8] sm:$0xf] }
  0x30   : > { %v1465_v54 = vld [vmem:[%s2082_s0 + $0xc] sm:$0xf]  ;;  %v1469_v0 = vld [vmem:[%s2082_s0 + $0x10] sm:$0xf] }
  0x32   : > { %288 = vrot.lane.b32.xlu0 %v284_v13, %s1760_s8  ;;  %292 = vrot.lane.b32.xlu1 %v285_v14, %s1760_s8 }
  0x36   : > { %488 = vrot.lane.b32.xlu0 %v276_v11, %s1761_s9  ;;  %490 = vrot.lane.b32.xlu1 %v284_v13, %s1761_s9 }
  0x3a   : > { %492 = vrot.lane.b32.xlu0 %v1890_v12, %s1761_s9  ;;  %494 = vrot.lane.b32.xlu1 %v285_v14, %s1761_s9 }
  0x3e   : > { %598 = vrot.lane.b32.xlu0 %v276_v11, %s1762_s10  ;;  %600 = vrot.lane.b32.xlu1 %v284_v13, %s1762_s10 }
  0x42   : > { %602 = vrot.lane.b32.xlu0 %v1890_v12, %s1762_s10  ;;  %604 = vrot.lane.b32.xlu1 %v285_v14, %s1762_s10 }
  0x46   : > { %708 = vrot.lane.b32.xlu0 %v276_v11, %s1763_s13  ;;  %710 = vrot.lane.b32.xlu1 %v284_v13, %s1763_s13 }
  0x4a   : > { %712 = vrot.lane.b32.xlu0 %v1890_v12, %s1763_s13  ;;  %714 = vrot.lane.b32.xlu1 %v285_v14, %s1763_s13 }
  0x4e   : > { %818 = vrot.lane.b32.xlu0 %v276_v11, %s1764_s14  ;;  %820 = vrot.lane.b32.xlu1 %v284_v13, %s1764_s14 }
  0x52   : > { %822 = vrot.lane.b32.xlu0 %v1890_v12, %s1764_s14  ;;  %824 = vrot.lane.b32.xlu1 %v285_v14, %s1764_s14 }
  0x56   : > { %928 = vrot.lane.b32.xlu0 %v276_v11, %s1765_s15  ;;  %930 = vrot.lane.b32.xlu1 %v284_v13, %s1765_s15 }
  0x5a   : > { %932 = vrot.lane.b32.xlu0 %v1890_v12, %s1765_s15  ;;  %934 = vrot.lane.b32.xlu1 %v285_v14, %s1765_s15 }
  0x5e   : > { %1038 = vrot.lane.b32.xlu0 %v276_v11, %s1766_s16  ;;  %1040 = vrot.lane.b32.xlu1 %v284_v13, %s1766_s16 }
  0x62   : > { %1042 = vrot.lane.b32.xlu0 %v1890_v12, %s1766_s16  ;;  %1044 = vrot.lane.b32.xlu1 %v285_v14, %s1766_s16  ;;  %s1496_s16 = smul.u32 24, %s1737_s21 }
  0x64   : > { %s1258_s27 = scalar_lea.vmem [#allocation2], %s1496_s16 }
  0x66   : > { %1148 = vrot.lane.b32.xlu0 %v276_v11, %s1767_s17  ;;  %1150 = vrot.lane.b32.xlu1 %v284_v13, %s1767_s17 }
  0x6a   : > { %1152 = vrot.lane.b32.xlu0 %v1890_v12, %s1767_s17  ;;  %1154 = vrot.lane.b32.xlu1 %v285_v14, %s1767_s17 }
  0xa0   : > { %v287_v15 = vpop.permute.xlu0 %286  ;;  %v291_v16 = vpop.permute.xlu1 %290 }
  0xa4   : > { %v289_v17 = vpop.permute.xlu0 %288  ;;  %v293_v18 = vpop.permute.xlu1 %292 }
  0xa5   : > { %v296_v19 = vsel %vm294_vm2, %v289_v17, %v291_v16  ;;  %v295_v20 = vsel %vm294_vm2, %v287_v15, %v289_v17  ;;  %v297_v21 = vsel %vm294_vm2, %v291_v16, %v293_v18 }
  0xa6   : > { %1455 = vmatprep.subr.msk.bf16.mxu0 %vm302_vm3, %v296_v19  ;;  %v304_v22 = vsel %vm302_vm3, %v295_v20, 0  ;;  %v310_v23 = vsel %vm302_vm3, %v297_v21, 0 }
  0xa7   : > { %327 = vmatpush1.bf16.msra.mxu0 %v304_v22  ;;  %1517 = vmatpush3.bf16.msra.mxu1 %v310_v23  ;;  %v1477_v23 = vld [vmem:[%s2082_s0 + $0x18] sm:$0xf] }
  0xa8   : > { %1458 = vmatprep.subr.msk.bf16.mxu0 %vm302_vm3, %v284_v13  ;;  %v489_v25 = vpop.permute.xlu0 %488  ;;  %v491_v27 = vpop.permute.xlu1 %490  ;;  %1522 = vmatprep.subr.bf16.mxu1 %v1757_v6  ;;  %v1473_v13 = vld [vmem:[%s2082_s0 + $0x14] sm:$0xf] }
  0xa9   : > { %v497_v31 = vsel %vm496_vm5, %v489_v25, %v491_v27 }
  0xaa   : > { %1456 = vmatmul.mubr.msk.bf16.vlgmr.msra.gmra.mxu0 %vm298_vm4, %v1454_v24  ;;  %1519 = vmatmul.mubr.msk.bf16.vlgmr.msra.gmra.mxu1 %vm298_vm4, %v1454_v24  ;;  %v504_v35 = vsel %vm302_vm3, %v497_v31, 0 }
  0xab   : > { %420 = vmatpush1.bf16.msra.mxu0 %v397_v26  ;;  %1523 = vmatpush3.bf16.msra.mxu1 %v403_v28 }
  0xac   : > { %v493_v29 = vpop.permute.xlu0 %492  ;;  %v495_v30 = vpop.permute.xlu1 %494  ;;  %437 = vmatprep.mubr.bf16.mxu0 %v1758_v9  ;;  %1524 = vmatprep.mubr.msk.bf16.mxu1 %vm1759_vm1, %v1757_v6 }
  0xad   : > { %v498_v32 = vsel %vm496_vm5, %v491_v27, %v493_v29  ;;  %v499_v33 = vsel %vm496_vm5, %v493_v29, %v495_v30  ;;  %1528 = vmatprep.subr.bf16.mxu1 %v1757_v6 }
  0xae   : > { %1462 = vmatprep.subr.msk.bf16.mxu0 %vm302_vm3, %v498_v32  ;;  %v510_v36 = vsel %vm302_vm3, %v499_v33, 0  ;;  %v1481_v33 = vld [vmem:[%s2082_s0 + $0x1c] sm:$0xf] }
  0xb0   : > { %v599_v37 = vpop.permute.xlu0 %598  ;;  %v601_v38 = vpop.permute.xlu1 %600 }
  0xb1   : > { %v607_v41 = vsel %vm606_vm6, %v599_v37, %v601_v38 }
  0xb2   : > { %1459 = vmatmul.mubr.msk.bf16.vlgmr.msra.gmra.mxu0 %vm298_vm4, %v265_v34  ;;  %1525 = vmatmul.mubr.msk.bf16.vlgmr.msra.gmra.mxu1 %vm298_vm4, %v265_v34  ;;  %v614_v45 = vsel %vm302_vm3, %v607_v41, 0 }
  0xb3   : > { %527 = vmatpush1.bf16.msra.mxu0 %v504_v35  ;;  %1529 = vmatpush3.bf16.msra.mxu1 %v510_v36  ;;  %v1485_v36 = vld [vmem:[%s2082_s0 + $0x20] sm:$0xf] }
  0xb4   : > { %v603_v39 = vpop.permute.xlu0 %602  ;;  %v605_v40 = vpop.permute.xlu1 %604  ;;  %544 = vmatprep.mubr.bf16.mxu0 %v1758_v9  ;;  %1530 = vmatprep.mubr.msk.bf16.mxu1 %vm1759_vm1, %v1757_v6 }
  0xb5   : > { %v608_v42 = vsel %vm606_vm6, %v601_v38, %v603_v39  ;;  %v609_v43 = vsel %vm606_vm6, %v603_v39, %v605_v40  ;;  %1534 = vmatprep.subr.bf16.mxu1 %v1757_v6 }
  0xb6   : > { %1466 = vmatprep.subr.msk.bf16.mxu0 %vm302_vm3, %v608_v42  ;;  %v620_v46 = vsel %vm302_vm3, %v609_v43, 0 }
  0xb8   : > { %v709_v47 = vpop.permute.xlu0 %708  ;;  %v711_v48 = vpop.permute.xlu1 %710 }
  0xb9   : > { %v717_v51 = vsel %vm716_vm7, %v709_v47, %v711_v48 }
  0xba   : > { %1463 = vmatmul.mubr.msk.bf16.vlgmr.msra.gmra.mxu0 %vm298_vm4, %v1461_v44  ;;  %1531 = vmatmul.mubr.msk.bf16.vlgmr.msra.gmra.mxu1 %vm298_vm4, %v1461_v44  ;;  %v724_v55 = vsel %vm302_vm3, %v717_v51, 0 }
  0xbb   : > { %637 = vmatpush1.bf16.msra.mxu0 %v614_v45  ;;  %1535 = vmatpush3.bf16.msra.mxu1 %v620_v46 }
  0xbc   : > { %v713_v49 = vpop.permute.xlu0 %712  ;;  %v715_v50 = vpop.permute.xlu1 %714  ;;  %654 = vmatprep.mubr.bf16.mxu0 %v1758_v9  ;;  %1536 = vmatprep.mubr.msk.bf16.mxu1 %vm1759_vm1, %v1757_v6 }
  0xbd   : > { %v718_v52 = vsel %vm716_vm7, %v711_v48, %v713_v49  ;;  %v719_v53 = vsel %vm716_vm7, %v713_v49, %v715_v50  ;;  %1540 = vmatprep.subr.bf16.mxu1 %v1757_v6 }
  0xbe   : > { %1470 = vmatprep.subr.msk.bf16.mxu0 %vm302_vm3, %v718_v52  ;;  %v730_v56 = vsel %vm302_vm3, %v719_v53, 0 }
  0xc0   : > { %v819_v57 = vpop.permute.xlu0 %818  ;;  %v821_v58 = vpop.permute.xlu1 %820 }
  0xc1   : > { %v827_v61 = vsel %vm826_vm8, %v819_v57, %v821_v58 }
  0xc2   : > { %1467 = vmatmul.mubr.msk.bf16.vlgmr.msra.gmra.mxu0 %vm298_vm4, %v1465_v54  ;;  %1537 = vmatmul.mubr.msk.bf16.vlgmr.msra.gmra.mxu1 %vm298_vm4, %v1465_v54  ;;  %v834_v1 = vsel %vm302_vm3, %v827_v61, 0 }
  0xc3   : > { %747 = vmatpush1.bf16.msra.mxu0 %v724_v55  ;;  %1541 = vmatpush3.bf16.msra.mxu1 %v730_v56 }
  0xc4   : > { %v823_v59 = vpop.permute.xlu0 %822  ;;  %v825_v60 = vpop.permute.xlu1 %824  ;;  %764 = vmatprep.mubr.bf16.mxu0 %v1758_v9  ;;  %1542 = vmatprep.mubr.msk.bf16.mxu1 %vm1759_vm1, %v1757_v6 }
  0xc5   : > { %v828_v62 = vsel %vm826_vm8, %v821_v58, %v823_v59  ;;  %v829_v63 = vsel %vm826_vm8, %v823_v59, %v825_v60  ;;  %1546 = vmatprep.subr.bf16.mxu1 %v1757_v6 }
  0xc6   : > { %1474 = vmatprep.subr.msk.bf16.mxu0 %vm302_vm3, %v828_v62  ;;  %v840_v2 = vsel %vm302_vm3, %v829_v63, 0 }
  0xc8   : > { %v929_v3 = vpop.permute.xlu0 %928  ;;  %v931_v4 = vpop.permute.xlu1 %930 }
  0xc9   : > { %v937_v10 = vsel %vm936_vm9, %v929_v3, %v931_v4 }
  0xca   : > { %1471 = vmatmul.mubr.msk.bf16.vlgmr.msra.gmra.mxu0 %vm298_vm4, %v1469_v0  ;;  %1543 = vmatmul.mubr.msk.bf16.vlgmr.msra.gmra.mxu1 %vm298_vm4, %v1469_v0  ;;  %v944_v14 = vsel %vm302_vm3, %v937_v10, 0 }
  0xcb   : > { %857 = vmatpush1.bf16.msra.mxu0 %v834_v1  ;;  %1547 = vmatpush3.bf16.msra.mxu1 %v840_v2 }
  0xcc   : > { %v933_v7 = vpop.permute.xlu0 %932  ;;  %v935_v8 = vpop.permute.xlu1 %934  ;;  %874 = vmatprep.mubr.bf16.mxu0 %v1758_v9  ;;  %1548 = vmatprep.mubr.msk.bf16.mxu1 %vm1759_vm1, %v1757_v6 }
  0xcd   : > { %v938_v11 = vsel %vm936_vm9, %v931_v4, %v933_v7  ;;  %v939_v12 = vsel %vm936_vm9, %v933_v7, %v935_v8  ;;  %1552 = vmatprep.subr.bf16.mxu1 %v1757_v6 }
  0xce   : > { %1478 = vmatprep.subr.msk.bf16.mxu0 %vm302_vm3, %v938_v11  ;;  %v950_v15 = vsel %vm302_vm3, %v939_v12, 0 }
  0xd0   : > { %v1039_v16 = vpop.permute.xlu0 %1038  ;;  %v1041_v17 = vpop.permute.xlu1 %1040 }
  0xd1   : > { %v1047_v20 = vsel %vm1046_vm10, %v1039_v16, %v1041_v17 }
  0xd2   : > { %1475 = vmatmul.mubr.msk.bf16.vlgmr.msra.gmra.mxu0 %vm298_vm4, %v1473_v13  ;;  %1549 = vmatmul.mubr.msk.bf16.vlgmr.msra.gmra.mxu1 %vm298_vm4, %v1473_v13  ;;  %v1054_v24 = vsel %vm302_vm3, %v1047_v20, 0 }
  0xd3   : > { %967 = vmatpush1.bf16.msra.mxu0 %v944_v14  ;;  %1553 = vmatpush3.bf16.msra.mxu1 %v950_v15 }
  0xd4   : > { %v1043_v18 = vpop.permute.xlu0 %1042  ;;  %v1045_v19 = vpop.permute.xlu1 %1044  ;;  %984 = vmatprep.mubr.bf16.mxu0 %v1758_v9  ;;  %1554 = vmatprep.mubr.msk.bf16.mxu1 %vm1759_vm1, %v1757_v6 }
  0xd5   : > { %v1048_v21 = vsel %vm1046_vm10, %v1041_v17, %v1043_v18  ;;  %v1049_v22 = vsel %vm1046_vm10, %v1043_v18, %v1045_v19  ;;  %1558 = vmatprep.subr.bf16.mxu1 %v1757_v6 }
  0xd6   : > { %1482 = vmatprep.subr.msk.bf16.mxu0 %vm302_vm3, %v1048_v21  ;;  %v1060_v25 = vsel %vm302_vm3, %v1049_v22, 0 }
  0xd8   : > { %v1149_v26 = vpop.permute.xlu0 %1148  ;;  %v1151_v27 = vpop.permute.xlu1 %1150 }
  0xd9   : > { %v1157_v30 = vsel %vm1156_vm11, %v1149_v26, %v1151_v27 }
  0xda   : > { %1479 = vmatmul.mubr.msk.bf16.vlgmr.msra.gmra.mxu0 %vm298_vm4, %v1477_v23  ;;  %1555 = vmatmul.mubr.msk.bf16.vlgmr.msra.gmra.mxu1 %vm298_vm4, %v1477_v23  ;;  %v1164_v34 = vsel %vm302_vm3, %v1157_v30, 0 }
  0xdb   : > { %1077 = vmatpush1.bf16.msra.mxu0 %v1054_v24  ;;  %1559 = vmatpush3.bf16.msra.mxu1 %v1060_v25 }
  0xdc   : > { %v1153_v28 = vpop.permute.xlu0 %1152  ;;  %v1155_v29 = vpop.permute.xlu1 %1154  ;;  %1094 = vmatprep.mubr.bf16.mxu0 %v1758_v9  ;;  %1560 = vmatprep.mubr.msk.bf16.mxu1 %vm1759_vm1, %v1757_v6 }
  0xdd   : > { %v1158_v31 = vsel %vm1156_vm11, %v1151_v27, %v1153_v28  ;;  %v1159_v32 = vsel %vm1156_vm11, %v1153_v28, %v1155_v29  ;;  %1564 = vmatprep.subr.bf16.mxu1 %v1757_v6 }
  0xde   : > { %1486 = vmatprep.subr.msk.bf16.mxu0 %vm302_vm3, %v1158_v31  ;;  %v1170_v35 = vsel %vm302_vm3, %v1159_v32, 0 }
  0xe2   : > { %1483 = vmatmul.mubr.msk.bf16.vlgmr.msra.gmra.mxu0 %vm298_vm4, %v1481_v33  ;;  %1561 = vmatmul.mubr.msk.bf16.vlgmr.msra.gmra.mxu1 %vm298_vm4, %v1481_v33 }
  0xe3   : > { %1187 = vmatpush1.bf16.msra.mxu0 %v1164_v34  ;;  %1565 = vmatpush3.bf16.msra.mxu1 %v1170_v35 }
  0xe4   : > { %1204 = vmatprep.mubr.bf16.mxu0 %v1758_v9  ;;  %1566 = vmatprep.mubr.msk.bf16.mxu1 %vm1759_vm1, %v1757_v6 }
  0xea   : > { %1487 = vmatmul.mubr.msk.bf16.vlgmr.msra.gmra.mxu0 %vm298_vm4, %v1485_v36  ;;  %1567 = vmatmul.mubr.msk.bf16.vlgmr.msra.gmra.mxu1 %vm298_vm4, %v1485_v36 }
 0x16a   : > { %v346_v37 = vpop.f32.mrf.mxu0  ;;  %v387_v38 = vpop.f32.mrf.mxu1 }
 0x16c   : > { %v348_v39 = vpop.f32.mrf.mxu0  ;;  %v1520_v40 = vpop.f32.mrf.mxu1 }
 0x16e   : > { %v350_v41 = vpop.f32.mrf.mxu0  ;;  %v390_v42 = vpop.f32.mrf.mxu1 }
 0x170   : > { %v351_v43 = vpop.f32.mrf.mxu0  ;;  %v1521_v44 = vpop.f32.mrf.mxu1 }
 0x172   : > { %v439_v9 = vpop.f32.mrf.mxu0  ;;  %v480_v45 = vpop.f32.mrf.mxu1 }
 0x173   : > { %v440_v26 = vadd.f32 %v439_v9, %v346_v37  ;;  %v481_v27 = vadd.f32 %v480_v45, %v387_v38 }
 0x174   : > { %v441_v46 = vpop.f32.mrf.mxu0  ;;  %v1526_v6 = vpop.f32.mrf.mxu1 }
 0x175   : > { %v442_v30 = vadd.f32 %v441_v46, %v348_v39  ;;  %v1267_v46 = vsub.s32 0, %v1883_v5 }
 0x176   : > { %v443_v47 = vpop.f32.mrf.mxu0  ;;  %v483_v48 = vpop.f32.mrf.mxu1 }
 0x178   : > { %v444_v49 = vpop.f32.mrf.mxu0  ;;  %v1527_v50 = vpop.f32.mrf.mxu1 }
 0x17a   : > { %v546_v51 = vpop.f32.mrf.mxu0  ;;  %v587_v52 = vpop.f32.mrf.mxu1 }
 0x17b   : > { %v593_v31 = vadd.f32 %v546_v51, %v440_v26  ;;  %v595_v32 = vadd.f32 %v587_v52, %v481_v27  ;;  %v1262_v52 = vld [vmem:[%s2075_s2] sm:$0x7]  ;;  %v1263_v26 = vld [vmem:[#allocation3] sm:$0xff] }
 0x17c   : > { %v548_v53 = vpop.f32.mrf.mxu0  ;;  %v1532_v54 = vpop.f32.mrf.mxu1 }
 0x17d   : > { %v594_v35 = vadd.f32 %v548_v53, %v442_v30  ;;  %v1271_v53 = vsub.s32 1, %v1883_v5 }
 0x17e   : > { %v550_v55 = vpop.f32.mrf.mxu0  ;;  %v590_v56 = vpop.f32.mrf.mxu1 }
 0x180   : > { %v551_v57 = vpop.f32.mrf.mxu0  ;;  %v1533_v58 = vpop.f32.mrf.mxu1 }
 0x182   : > { %v656_v59 = vpop.f32.mrf.mxu0  ;;  %v697_v60 = vpop.f32.mrf.mxu1 }
 0x183   : > { %v703_v36 = vadd.f32 %v656_v59, %v593_v31  ;;  %v705_v40 = vadd.f32 %v697_v60, %v595_v32  ;;  %v1275_v59 = vsub.s32 2, %v1883_v5 }
 0x184   : > { %v658_v61 = vpop.f32.mrf.mxu0  ;;  %v1538_v62 = vpop.f32.mrf.mxu1 }
 0x185   : > { %v704_v43 = vadd.f32 %v658_v61, %v594_v35  ;;  %v1268_v61 = vrot.slane %v1262_v52, %v1267_v46 }
 0x186   : > { %v660_v63 = vpop.f32.mrf.mxu0  ;;  %v700_v0 = vpop.f32.mrf.mxu1 }
 0x188   : > { %v661_v1 = vpop.f32.mrf.mxu0  ;;  %v1539_v2 = vpop.f32.mrf.mxu1 }
 0x189   : > { %v1272_v2 = vrot.slane %v1262_v52, %v1271_v53 }
 0x18a   : > { %v766_v3 = vpop.f32.mrf.mxu0  ;;  %v807_v4 = vpop.f32.mrf.mxu1 }
 0x18b   : > { %v813_v44 = vadd.f32 %v766_v3, %v703_v36  ;;  %v815_v6 = vadd.f32 %v807_v4, %v705_v40 }
 0x18c   : > { %v768_v7 = vpop.f32.mrf.mxu0  ;;  %v1544_v8 = vpop.f32.mrf.mxu1 }
 0x18d   : > { %v814_v37 = vadd.f32 %v768_v7, %v704_v43 }
 0x18e   : > { %v770_v10 = vpop.f32.mrf.mxu0  ;;  %v810_v11 = vpop.f32.mrf.mxu1 }
 0x18f   : > { %v1276_v10 = vrot.slane %v1262_v52, %v1275_v59 }
 0x190   : > { %v771_v12 = vpop.f32.mrf.mxu0  ;;  %v1545_v13 = vpop.f32.mrf.mxu1 }
 0x192   : > { %v876_v14 = vpop.f32.mrf.mxu0  ;;  %v917_v15 = vpop.f32.mrf.mxu1 }
 0x193   : > { %v923_v38 = vadd.f32 %v876_v14, %v813_v44  ;;  %v925_v9 = vadd.f32 %v917_v15, %v815_v6 }
 0x194   : > { %v878_v16 = vpop.f32.mrf.mxu0  ;;  %v1550_v17 = vpop.f32.mrf.mxu1 }
 0x195   : > { %v924_v49 = vadd.f32 %v878_v16, %v814_v37 }
 0x196   : > { %v880_v18 = vpop.f32.mrf.mxu0  ;;  %v920_v19 = vpop.f32.mrf.mxu1 }
 0x198   : > { %v881_v20 = vpop.f32.mrf.mxu0  ;;  %v1551_v21 = vpop.f32.mrf.mxu1 }
 0x19a   : > { %v986_v22 = vpop.f32.mrf.mxu0  ;;  %v1027_v23 = vpop.f32.mrf.mxu1 }
 0x19b   : > { %v1033_v50 = vadd.f32 %v986_v22, %v923_v38  ;;  %v1035_v51 = vadd.f32 %v1027_v23, %v925_v9 }
 0x19c   : > { %v988_v24 = vpop.f32.mrf.mxu0  ;;  %v1556_v25 = vpop.f32.mrf.mxu1 }
 0x19d   : > { %v1034_v56 = vadd.f32 %v988_v24, %v924_v49 }
 0x19e   : > { %v990_v28 = vpop.f32.mrf.mxu0  ;;  %v1030_v29 = vpop.f32.mrf.mxu1 }
 0x19f   : > { %v1290_v28 = vld [vmem:[#allocation4] sm:$0xff] }
 0x1a0   : > { %v991_v33 = vpop.f32.mrf.mxu0  ;;  %v1557_v34 = vpop.f32.mrf.mxu1 }
 0x1a2   : > { %v1096_v41 = vpop.f32.mrf.mxu0  ;;  %v1137_v42 = vpop.f32.mrf.mxu1 }
 0x1a3   : > { %v1143_v57 = vadd.f32 %v1096_v41, %v1033_v50  ;;  %v1145_v58 = vadd.f32 %v1137_v42, %v1035_v51 }
 0x1a4   : > { %v1098_v47 = vpop.f32.mrf.mxu0  ;;  %v1562_v48 = vpop.f32.mrf.mxu1 }
 0x1a5   : > { %v1144_v63 = vadd.f32 %v1098_v47, %v1034_v56 }
 0x1a6   : > { %v1100_v45 = vpop.f32.mrf.mxu0  ;;  %v1140_v39 = vpop.f32.mrf.mxu1 }
 0x1a8   : > { %v1101_v54 = vpop.f32.mrf.mxu0  ;;  %v1563_v55 = vpop.f32.mrf.mxu1 }
 0x1aa   : > { %v1206_v60 = vpop.f32.mrf.mxu0  ;;  %v1247_v62 = vpop.f32.mrf.mxu1 }
 0x1ab   : > { %v1253_v0 = vadd.f32 %v1206_v60, %v1143_v57  ;;  %v1255_v1 = vadd.f32 %v1247_v62, %v1145_v58 }
 0x1ac   : > { %v1208_v3 = vpop.f32.mrf.mxu0  ;;  %v1568_v4 = vpop.f32.mrf.mxu1 }
 0x1ad   : > { %1259 = vst [vmem:[%s1258_s27] sm:$0xff] %v1253_v0  ;;  %v1291_v7 = vmul.f32 %v1253_v0, %v1253_v0  ;;  %1261 = vst [vmem:[%s1258_s27 + $0x10] sm:$0xff] %v1255_v1  ;;  %v1254_v8 = vadd.f32 %v1208_v3, %v1144_v63  ;;  %v1280_v13 = vmul.f32 %v1268_v61, %v1253_v0 }
 0x1ae   : > { %v1210_v11 = vpop.f32.mrf.mxu0  ;;  %v1250_v12 = vpop.f32.mrf.mxu1  ;;  %v1293_v14 = vmul.f32 %v1255_v1, %v1255_v1  ;;  %v1282_v18 = vmul.f32 %v1276_v10, %v1255_v1 }
 0x1af   : > { %1260 = vst [vmem:[%s1258_s27 + $0x8] sm:$0xff] %v1254_v8  ;;  %v1281_v5 = vmul.f32 %v1272_v2, %v1254_v8  ;;  %v1292_v15 = vmul.f32 %v1254_v8, %v1254_v8  ;;  %v1294_v20 = vmul.f32 %v1291_v7, %v1268_v61 }
 0x1b0   : > { %v1211_v16 = vpop.f32.mrf.mxu0  ;;  %v1569_v17 = vpop.f32.mrf.mxu1  ;;  %v1296_v23 = vmul.f32 %v1293_v14, %v1276_v10 }
 0x1b1   : > { %v1283_v19 = vadd.f32 %v1281_v5, %v1280_v13  ;;  %v1295_v21 = vmul.f32 %v1292_v15, %v1272_v2 }
 0x1b3   : > { %v1284_v22 = vadd.f32 %v1283_v19, %v1282_v18  ;;  %v1297_v24 = vadd.f32 %v1295_v21, %v1294_v20 }
 0x1b5   : > { %1285 = vadd.xlane.f32.xlu0 %v1284_v22  ;;  %v1298_v25 = vadd.f32 %v1297_v24, %v1296_v23 }
 0x1b7   : > { %1299 = vadd.xlane.f32.xlu1 %v1298_v25 }
 0x23e   : > { %v1286_v27 = vpop.xlane.xlu0 %1285 }
 0x23f   : > { %v1287_v29 = vadd.f32 %v1286_v27, %v1263_v26 }
 0x240   : > { %v1300_v30 = vpop.xlane.xlu1 %1299 }
 0x241   : > { %1289 = vst.msk [vmem:[#allocation3] sm:$0xff] %vm1288_vm12, %v1287_v29  ;;  %v1301_v31 = vadd.f32 %v1300_v30, %v1290_v28 }
 0x243   : > { %1302 = vst.msk [vmem:[#allocation4] sm:$0xff] %vm1288_vm12, %v1301_v31 }
 0x244 PF: > { %p1490_p1 = scmp.ne.s32.totalorder %s1741_s22, 1 }
 0x245   : > { %s1497_s14 = smul.u32 (!%p1490_p1), 24, %s1737_s21 }
 0x246   : > { %1306 = sbr.rel (%p1490_p1) target bundleno = 749 (0x2ed), region = 52 }
 0x247   : > { %s1323_s15 = scalar_lea.vmem (!%p1490_p1), [#allocation2], %s1497_s14 }
 0x24b   : > { %v1307_v32 = vld [vmem:[#allocation3] sm:$0xff]  ;;  %v1309_v33 = vld [vmem:[#allocation4] sm:$0xff]  ;;  %v1768_v34 = vmov 0   ;;  %v1314_v44 = vld [vmem:[%s2076_s3] sm:$0xff] }
 0x24c   : > { %1658 = vset.pattern.permute.xlu0 %v1768_v34  ;;  %v1308_v35 = vmul.f32 0.001953125, %v1307_v32  ;;  %v1310_v36 = vmul.f32 0.001953125, %v1309_v33  ;;  %v1318_v48 = vld [vmem:[%s2077_s4] sm:$0xff]  ;;  %v1325_v45 = vld [vmem:[%s1323_s15 + $0x8] sm:$0xff]  ;;  %v1326_v39 = vld [vmem:[%s1323_s15 + $0x10] sm:$0xff] }
 0x24d   : > { %v1324_v9 = vld [vmem:[%s1323_s15] sm:$0xff] }
 0x24e   : > { %v1311_v40 = vmul.f32 %v1308_v35, %v1308_v35 }
 0x250   : > { %v1312_v41 = vsub.f32 %v1310_v36, %v1311_v40 }
 0x252   : > { %v1313_v42 = vmax.f32 %v1312_v41, 0.0 }
 0x254   : > { %v1315_v43 = vadd.f32 1e-05, %v1313_v42 }
 0x256   : > { %1659 = vrsqrt.f32 %v1315_v43 }
 0x263   : > { %v1660_v6 = vpop.eup %1659 }
 0x264   : > { %v1317_v47 = vmul.f32 %v1660_v6, %v1314_v44 }
 0x266   : > { %1329 = vperm.xlu0 %1658, %v1317_v47   ;;  %v1319_v37 = vmul.f32 %v1317_v47, %v1308_v35 }
 0x268   : > { %v1320_v38 = vsub.f32 %v1318_v48, %v1319_v37 }
 0x26a   : > { %1337 = vperm.xlu0 %1658, %v1320_v38  }
 0x2e1   : > { %v1330_v46 = vpop.permute.xlu0 %1329 }
 0x2e2   : > { %v1332_v49 = vmul.f32 %v1330_v46, %v1324_v9  ;;  %v1333_v50 = vmul.f32 %v1330_v46, %v1325_v45  ;;  %v1334_v51 = vmul.f32 %v1330_v46, %v1326_v39 }
 0x2e5   : > { %v1338_v52 = vpop.permute.xlu0 %1337 }
 0x2e6   : > { %v1340_v53 = vadd.f32 %v1338_v52, %v1332_v49  ;;  %v1341_v54 = vadd.f32 %v1338_v52, %v1333_v50  ;;  %v1342_v55 = vadd.f32 %v1338_v52, %v1334_v51 }
 0x2e8   : > { %vm1343_vm13 = vcmp.gt.f32.partialorder %v1340_v53, 0.0  ;;  %vm1344_vm14 = vcmp.gt.f32.partialorder %v1341_v54, 0.0  ;;  %vm1345_vm15 = vcmp.gt.f32.partialorder %v1342_v55, 0.0  ;;  %v1346_v56 = vmul.f32 0.1, %v1340_v53 }
 0x2e9   : > { %v1347_v57 = vmul.f32 0.1, %v1341_v54  ;;  %v1348_v58 = vmul.f32 0.1, %v1342_v55 }
 0x2ea   : > { %v1349_v59 = vsel %vm1343_vm13, %v1340_v53, %v1346_v56 }
 0x2eb   : > { %v1350_v60 = vsel %vm1344_vm14, %v1341_v54, %v1347_v57  ;;  %v1351_v61 = vsel %vm1345_vm15, %v1342_v55, %v1348_v58  ;;  %1352 = vst [vmem:[%s1879_s30] sm:$0xff] %v1349_v59 }
 0x2ec   : > { %1353 = vst [vmem:[%s1879_s30 + $0x8] sm:$0xff] %v1350_v60  ;;  %1354 = vst [vmem:[%s1879_s30 + $0x10] sm:$0xff] %v1351_v61 }
 0x2ed PF: > { %s1363_s16 = smul.u32 %s1737_s21, %s1741_s22  ;;  %s1371_s17 = sshll.u32 %s1879_s30, 4  ;;  %s1372_s17 = int_to_ptr.vmem [resolvable:$true] %s1371_s17 }
 0x2ee   : > { %s1356_s10 = scalar_lea.sflag [#allocation6], %s239_s12  ;;  %s1661_s13 = scalar_lea.vmem %s1372_s17, 384 }
 0x2ef   : > { %s1571_s26 = smul.u32 384, %s1363_s16  ;;  %p1662_p2 = scmp.ne.s32.totalorder %s1372_s17, %s1661_s13 }
 0x2f0   : > { %s1769_s14 = smov [#allocation5]  }
 0x2f1   : > { %s1369_s9 = scalar_lea.hbm %s2078_s5, %s1571_s26  ;;  %p1663_p3 = pnand %p1662_p2, %p1853_p6 }
 0x2f2   : > { %s1665_s15 = sshll.u32 %s1769_s14, 4  ;;  %s1666_s15 = int_to_ptr.vmem [resolvable:$false] %s1665_s15 }
 0x2f3   : > { %p1664_p4 = pneg %p1663_p3  ;;  %s1667_s0 = scalar_lea.vmem %s1666_s15, 768 }
 0x2f4   : > { %p1668_p5 = scmp.lt.s32.totalorder %s1372_s17, %s1666_s15  ;;  %p1669_p7 = scmp.lt.s32.totalorder %s1667_s0, %s1661_s13 }
 0x2f6   : > { %p1670_p9 = por %p1669_p7, %p1668_p5 }
 0x2f8   : > { %p1671_p10 = pnand %p1670_p9, %p1664_p4 }
 0x2fa   : > { %1674 = shalt.err (!%p1671_p10)
}
 0x2fb   : > { %s1675_s21 = scalar_lea.hbm %s1369_s9, 384  ;;  %s1679_s30 = scalar_lea.hbm %s2078_s5, 768 }
 0x2fc   : > { %p1676_p11 = scmp.ne.s32.totalorder %s1369_s9, %s1675_s21  ;;  %p1680_p0 = scmp.lt.s32.totalorder %s1369_s9, %s2078_s5 }
 0x2fd   : > { %p1681_p1 = scmp.lt.s32.totalorder %s1679_s30, %s1675_s21 }
 0x2fe   : > { %p1677_p12 = pnand %p1676_p11, %p1853_p6 }
 0x2ff   : > { %p1682_p2 = por %p1681_p1, %p1680_p0 }
 0x300   : > { %p1678_p13 = pneg %p1677_p12 }
 0x302   : > { %p1683_p3 = pnand %p1682_p2, %p1678_p13 }
 0x304   : > { %1686 = shalt.err (!%p1683_p3)
}
 0x305   : > { %1572 = dma.vmem_to_hbm [thread:$0]  (%p1853_p6), %s1372_s17, 384, %s1369_s9, %s1356_s10  }
 0x306 PF: > { %p1578_p4 = scmp.ge.s32.totalorder %s1753_s25, 2  ;;  %s1383_s0 = sand.u32 1, %s1725_s18  }
 0x307   : > { %s1384_s27 = scalar_lea.sflag [#allocation6], %s1383_s0 }
 0x308   : > { %p1575_p5 = pnand %p1578_p4, %p1860_p8 }
 0x30a   : > { %p1576_p7 = pneg %p1575_p5 }
 0x30c   : > { %1720 = dma.done.wait (%p1576_p7), %s1384_s27, 384  }
 0x30d   : > { %1722 = vsyncadd (%p1576_p7), %s1384_s27, 4294966912  ;;  %s18_s25 = sadd.s32 1, %s1753_s25   ;;  %s2083_s18 = smov %s1729_s19 }
 0x30e   : > { %p15_p9 = scmp.ge.s32.totalorder %s18_s25, 6   ;;  %s2084_s19 = smov %s1733_s20 }
 0x30f   : > { %s2085_s20 = smov %s1869_s11  ;;  %s2086_s21 = smov %s1745_s23 }
 0x310   : > { %s2087_s22 = smov %s1749_s24  ;;  %s2088_s23 = smov %s2091_s28 }
 0x311   : > { %s2089_s24 = smov %s2095_s29  ;;  %17 = sbr.rel (!%p15_p9) target bundleno = 7 (0x7), region = 97 }
 0x316   :  { %1389 = vsyncpa [#allocation6], 1 }
 0x317   :  { %1391 = vsyncpa [#allocation6 + $0x1], 1 }

</bundles_post_ra>
